<compile_context>
chip_gen: v7x
topology: tpu7x:2x2x1
jax: 0.10.0
libtpu: 0.0.40
codegen_flags: <defaults>
</compile_context>

<pallas_src>
import functools

import jax
import jax.numpy as jnp
from jax import lax
from jax.experimental import pallas as pl
from jax.experimental.pallas import tpu as pltpu


def _round_up(x: int, m: int) -> int:
    return (x + m - 1) // m * m


def skipgram_kernel(emb_ref, w_ref, b_ref, out_ref):
    # emb_ref: [tm, E] bf16   w_ref: [tn, E] bf16   b_ref: [1, tn] f32
    # out_ref: [tm, tn] f32
    logits = lax.dot_general(
        emb_ref[...],
        w_ref[...],
        dimension_numbers=(((1,), (1,)), ((), ())),   # contract on E, no batch
        preferred_element_type=jnp.float32,
    )
    out_ref[...] = (logits + b_ref[...]).astype(out_ref.dtype)


def prepare_params(emb_table, lin_w, lin_b):
    """One-time parameter prep (outside the per-call hot path).

    Stores the Linear weight as bf16 so the forward pass never pays a
    separate V*E*4-byte convert pass over HBM.
    """
    return (
        emb_table.astype(jnp.float32),      # [V, E] embedding table (gather source)
        lin_w.astype(jnp.bfloat16),         # [V, E] output-layer weight, bf16
        lin_b.astype(jnp.float32),          # [V]    output-layer bias
    )


def skipgram_forward(contexts, emb_table, lin_w_bf16, lin_b, *,
                     tn=512, tm=1024, out_dtype=jnp.float32):
    """SkipGram forward: logits[b, l, v] = emb_table[ctx[b, l]] @ lin_w.T + lin_b."""
    B, L = contexts.shape
    V, E = lin_w_bf16.shape
    N = B * L

    # TODO(synk): jnp.take clamps out-of-range ids; PyTorch nn.Embedding raises.
    ids = contexts.reshape(N).astype(jnp.int32)
    emb = jnp.take(emb_table, ids, axis=0).astype(jnp.bfloat16)   # [N, E] (tiny)

    # --- vocab tiling / padding (lane-dense, multiple of 128) ----------------
    tn = min(tn, _round_up(V, 128))
    V_pad = _round_up(V, tn)
    if V_pad != V:
        w = jnp.pad(lin_w_bf16, ((0, V_pad - V), (0, 0)))
        bias = jnp.pad(lin_b, (0, V_pad - V))
    else:
        w = lin_w_bf16
        bias = lin_b
    bias = bias.reshape(1, V_pad).astype(jnp.float32)

    flops = 2.0 * N * V_pad * E
    vmem_budget = 40 * 1024 * 1024          # comfortable inside v7x's 64 MiB
    vmem_limit = 48 * 1024 * 1024

    # Footprint if we hold the gathered embeddings fully resident.
    n_res = _round_up(max(N, 16), 16)       # 16-row sublane packing for bf16
    resident_bytes = (
        2 * n_res * E * 2                   # emb (Pallas may double-buffer it)
        + 2 * tn * E * 2                    # W tile, double-buffered
        + 2 * n_res * tn * 4                # f32 output tile, double-buffered
        + 2 * tn * 4                        # bias tile
    )

    if resident_bytes <= vmem_budget:
        # ---- Variant A: emb resident, 1-D grid over vocab; W streams once ----
        N_pad = n_res
        if N_pad != N:
            emb = jnp.pad(emb, ((0, N_pad - N), (0, 0)))
        bytes_accessed = int(N_pad * E * 2 + V_pad * E * 2 + V_pad * 4
                             + N_pad * V_pad * 4)
        out = pl.pallas_call(
            skipgram_kernel,
            out_shape=jax.ShapeDtypeStruct((N_pad, V_pad), out_dtype),
            grid_spec=pltpu.PrefetchScalarGridSpec(
                num_scalar_prefetch=0,
                grid=(V_pad // tn,),
                in_specs=[
                    pl.BlockSpec((N_pad, E), lambda j: (0, 0)),   # resident emb
                    pl.BlockSpec((tn, E), lambda j: (j, 0)),      # weight tile
                    pl.BlockSpec((1, tn), lambda j: (0, j)),      # bias tile
                ],
                out_specs=pl.BlockSpec((N_pad, tn), lambda j: (0, j)),
            ),
            compiler_params=pltpu.CompilerParams(
                dimension_semantics=("parallel",),
                vmem_limit_bytes=vmem_limit,
            ),
            cost_estimate=pl.CostEstimate(
                flops=int(flops), transcendentals=0,
                bytes_accessed=bytes_accessed),
        )(emb, w, bias)
    else:
        # ---- Variant B: vocab axis leading, rows inner.  Each weight tile's
        # block index is constant across the inner row loop, so W is DMA'd from
        # HBM exactly once per call; only the (small) emb stream repeats.
        tm_eff = min(tm, _round_up(N, 16))
        N_pad = _round_up(N, tm_eff)
        if N_pad != N:
            emb = jnp.pad(emb, ((0, N_pad - N), (0, 0)))
        bytes_accessed = int(V_pad * E * 2
                             + (V_pad // tn) * N_pad * E * 2
                             + V_pad * 4 + N_pad * V_pad * 4)
        out = pl.pallas_call(
            skipgram_kernel,
            out_shape=jax.ShapeDtypeStruct((N_pad, V_pad), out_dtype),
            grid_spec=pltpu.PrefetchScalarGridSpec(
                num_scalar_prefetch=0,
                grid=(V_pad // tn, N_pad // tm_eff),      # vocab outer, rows inner
                in_specs=[
                    pl.BlockSpec((tm_eff, E), lambda j, i: (i, 0)),
                    pl.BlockSpec((tn, E), lambda j, i: (j, 0)),
                    pl.BlockSpec((1, tn), lambda j, i: (0, j)),
                ],
                out_specs=pl.BlockSpec((tm_eff, tn), lambda j, i: (j, i)),
            ),
            compiler_params=pltpu.CompilerParams(
                dimension_semantics=("parallel", "parallel"),
                vmem_limit_bytes=vmem_limit,
            ),
            cost_estimate=pl.CostEstimate(
                flops=int(flops), transcendentals=0,
                bytes_accessed=bytes_accessed),
        )(emb, w, bias)
        # out was written with vocab-major output blocks; shape is still (N_pad, V_pad).

    out = out[:N, :V]
    return out.reshape(B, L, V)


if __name__ == "__main__":
    # Small, TPU-tile friendly config matching the module's forward.
    vocab_size = 256
    emb_size = 128
    batch, seq = 2, 8

    key = jax.random.PRNGKey(0)
    k_ctx, k_emb, k_w, k_b = jax.random.split(key, 4)

    contexts = jax.random.randint(k_ctx, (batch, seq), 0, vocab_size, dtype=jnp.int32)
    # nn.Embedding default init ~ N(0, 1); nn.Linear default ~ U(-1/sqrt(E), 1/sqrt(E))
    emb_table = jax.random.normal(k_emb, (vocab_size, emb_size), dtype=jnp.float32)
    bound = 1.0 / (emb_size ** 0.5)
    lin_w = jax.random.uniform(k_w, (vocab_size, emb_size), jnp.float32, -bound, bound)
    lin_b = jax.random.uniform(k_b, (vocab_size,), jnp.float32, -bound, bound)

    # One-time param prep (bf16 weight cast hoisted out of the hot path).
    emb_p, w_p, b_p = prepare_params(emb_table, lin_w, lin_b)

    fwd = jax.jit(functools.partial(skipgram_forward))
    out = fwd(contexts, emb_p, w_p, b_p)
    out = jax.block_until_ready(out)
    assert out.shape == (batch, seq, vocab_size)

    # Reference with the same bf16-rounded operands and exact f32 accumulation,
    # so the check isolates kernel correctness from the (intentional) bf16 cast.
    emb_ref = jnp.take(emb_table, contexts, axis=0).astype(jnp.bfloat16).astype(jnp.float32)
    w_ref = lin_w.astype(jnp.bfloat16).astype(jnp.float32)
    ref = (
        jnp.einsum("ble,ve->blv", emb_ref, w_ref, precision=lax.Precision.HIGHEST)
        + lin_b
    )
    assert jnp.allclose(out, ref, atol=2e-3, rtol=2e-3), float(jnp.max(jnp.abs(out - ref)))

    print("KERNEL_OK")
</pallas_src>

<mosaic_0001>
module attributes {stable_mosaic.version = 11 : i64} {
  func.func @skipgram_kernel(%arg0: i32, %arg1: memref<16x128xbf16, #tpu.memory_space<vmem>>, %arg2: memref<256x128xbf16, #tpu.memory_space<vmem>>, %arg3: memref<1x256xf32, #tpu.memory_space<vmem>>, %arg4: memref<16x256xf32, #tpu.memory_space<vmem>>) attributes {dimension_semantics = [#tpu.dimension_semantics<parallel>], iteration_bounds = array<i64: 1>, scalar_prefetch = 0 : i64, scratch_operands = 0 : i64, tpu.core_type = #tpu.core_type<tc>, window_params = [{pipeline_mode = #tpu.pipeline_mode<synchronous>, transform_indices = @transform_0, window_bounds = array<i64: 16, 128>}, {transform_indices = @transform_1, window_bounds = array<i64: 256, 128>}, {transform_indices = @transform_2, window_bounds = array<i64: 1, 256>}, {transform_indices = @transform_3, window_bounds = array<i64: 16, 256>}]} {
    %c0 = arith.constant 0 : index
    %c0_0 = arith.constant 0 : index
    %0 = vector.load %arg1[%c0, %c0_0] : memref<16x128xbf16, #tpu.memory_space<vmem>>, vector<16x128xbf16>
    %c0_1 = arith.constant 0 : index
    %c0_2 = arith.constant 0 : index
    %1 = vector.load %arg2[%c0_1, %c0_2] : memref<256x128xbf16, #tpu.memory_space<vmem>>, vector<256x128xbf16>
    %cst = arith.constant dense<0.000000e+00> : vector<16x256xf32>
    %2 = tpu.matmul %0, %1, %cst {dimension_numbers = #tpu.dot_dimension_numbers<[1], [1], [0], [0], [0, 0, 1, 0], [], []>} : vector<16x128xbf16>, vector<256x128xbf16>, vector<16x256xf32> -> vector<16x256xf32>
    %c0_3 = arith.constant 0 : index
    %c0_4 = arith.constant 0 : index
    %3 = vector.load %arg3[%c0_3, %c0_4] : memref<1x256xf32, #tpu.memory_space<vmem>>, vector<1x256xf32>
    %4 = vector.broadcast %3 : vector<1x256xf32> to vector<16x256xf32>
    %5 = arith.addf %2, %4 : vector<16x256xf32>
    %c0_5 = arith.constant 0 : index
    %c0_6 = arith.constant 0 : index
    %6 = vector.load %arg4[%c0_5, %c0_6] : memref<16x256xf32, #tpu.memory_space<vmem>>, vector<16x256xf32>
    tpu.vector_store %arg4[%c0_5, %c0_6], %5 {strides = array<i32>} : memref<16x256xf32, #tpu.memory_space<vmem>>, vector<16x256xf32>,
    return
  }
  func.func @transform_0(%arg0: i32) -> (i32, i32) {
    %c0_i32 = arith.constant 0 : i32
    %c0_i32_0 = arith.constant 0 : i32
    %c0_i32_1 = arith.constant 0 : i32
    return %c0_i32, %c0_i32_0 : i32, i32
  }
  func.func @transform_1(%arg0: i32) -> (i32, i32) {
    %c0_i32 = arith.constant 0 : i32
    %c0_i32_0 = arith.constant 0 : i32
    return %arg0, %c0_i32 : i32, i32
  }
  func.func @transform_2(%arg0: i32) -> (i32, i32) {
    %c0_i32 = arith.constant 0 : i32
    %c0_i32_0 = arith.constant 0 : i32
    return %c0_i32, %arg0 : i32, i32
  }
  func.func @transform_3(%arg0: i32) -> (i32, i32) {
    %c0_i32 = arith.constant 0 : i32
    %c0_i32_0 = arith.constant 0 : i32
    return %c0_i32, %arg0 : i32, i32
  }
}

</mosaic_0001>

<bundles_post_ra>
// kernel: skipgram_forward.1
= control target key start
LH: loop header
LB: loop body
LE: loop exit
PB: predicated region body
PF: predicated region fallthrough
CT: control target
= control target key end

     0   :  { %8 = vsyncpa [#allocation3], 0  ;;  %s404_s0 = inlined_call_operand.vmem [shape: bf16[16,128], index: 0, kind: input, shape index: {}]   ;;  %s405_s1 = inlined_call_operand.hbm [shape: bf16[256,128], index: 1, kind: input, shape index: {}]   ;;  %s406_s2 = inlined_call_operand.vmem [shape: f32[1,256], index: 2, kind: input, shape index: {}]   ;;  %s407_s3 = inlined_call_operand.hbm [shape: f32[16,256], index: 3, kind: output, shape index: {}]  }
   0x1   :  { %9 = vsyncpa [#allocation4], 0  ;;  %s348_s12 = smov [#allocation2]   ;;  %s300_s16 = scalar_lea.hbm %s405_s1, 2048 }
   0x2   :  { %s17_s13 = sshll.u32 %s348_s12, 4  ;;  %p301_p0 = scmp.ne.s32.totalorder %s405_s1, %s300_s16  ;;  %s18_s13 = int_to_ptr.vmem [resolvable:$true] %s17_s13 }
   0x3   :  { %p304_p1 = scmp.lt.u32.totalorder %s300_s16, %s405_s1 }
   0x5   :  { %p306_p2 = pnand %p304_p1, %p301_p0 }
   0x7   :  { %309 = shalt.err (!%p306_p2)
}
   0x8   :  { %s310_s21 = scalar_lea.vmem %s18_s13, 2048  ;;  %p315_p4 = scmp.lt.s32.totalorder %s18_s13, %s18_s13 }
   0x9   :  { %p311_p3 = scmp.ne.s32.totalorder %s18_s13, %s310_s21  ;;  %p316_p5 = scmp.lt.s32.totalorder %s310_s21, %s310_s21 }
   0xb   :  { %p317_p6 = por %p316_p5, %p315_p4 }
   0xd   :  { %p318_p7 = pnand %p317_p6, %p311_p3 }
   0xf   :  { %321 = shalt.err (!%p318_p7)
}
  0x10   :  { %s349_s22 = smov 64   ;;  %s350_s23 = smov 4  }
  0x11   :  { %23 = dma.hbm_to_vmem [thread:$0]  %s405_s1, 2048, %s18_s13, [#allocation3], %s349_s22, %s349_s22, %s350_s23  }
  0x12   :  { %344 = dma.done.wait [#allocation3], 2048  }
  0x13   :  { %345 = vsyncadd [#allocation3], 4294965248  ;;  %v283_v0 = vld [vmem:[#allocation2 + $0x40] sm:$0xff]   ;;  %v285_v2 = vld [vmem:[#allocation2 + $0x48] sm:$0xff]   ;;  %v66_v17 = vlaneseq  ;;  %s351_s28 = smov [#allocation5]  }
  0x14   :  { %v284_v1 = vld [vmem:[#allocation2] sm:$0xff]   ;;  %259 = vmatprep.subr.bf16.mxu0 %v283_v0  ;;  %v286_v3 = vld [vmem:[#allocation2 + $0x8] sm:$0xff]   ;;  %v287_v4 = vld [vmem:[#allocation2 + $0x50] sm:$0xff]   ;;  %s230_s29 = sshll.u32 %s351_s28, 4  ;;  %s231_s29 = int_to_ptr.vmem [resolvable:$true] %s230_s29 }
  0x15   :  { %260 = vmatpush3.bf16.xpose.msra.mxu0 %v284_v1  ;;  %v288_v5 = vld [vmem:[#allocation2 + $0x10] sm:$0xff]   ;;  %v289_v6 = vld [vmem:[#allocation2 + $0x58] sm:$0xff]   ;;  %v299_v7 = vld [vmem:[%s404_s0] sm:$0xff]   ;;  %v67_v18 = vshrl.u32 %v66_v17, 7  ;;  %s322_s30 = scalar_lea.vmem %s231_s29, 512  ;;  %p327_p9 = scmp.lt.s32.totalorder %s231_s29, %s231_s29 }
  0x16   :  { %261 = vmatprep.subr.bf16.mxu0 %v285_v2  ;;  %275 = vmatprep.mubr.bf16.mxu0 %v299_v7  ;;  %v290_v8 = vld [vmem:[#allocation2 + $0x18] sm:$0xff]   ;;  %v291_v9 = vld [vmem:[#allocation2 + $0x60] sm:$0xff]   ;;  %v293_v11 = vld [vmem:[#allocation2 + $0x68] sm:$0xff]   ;;  %p323_p8 = scmp.ne.s32.totalorder %s231_s29, %s322_s30  ;;  %p328_p10 = scmp.lt.s32.totalorder %s322_s30, %s322_s30 }
  0x17   :  { %v292_v10 = vld [vmem:[#allocation2 + $0x20] sm:$0xff]   ;;  %v294_v12 = vld [vmem:[#allocation2 + $0x28] sm:$0xff]   ;;  %v295_v13 = vld [vmem:[#allocation2 + $0x70] sm:$0xff]   ;;  %v68_v19 = vsub.s32 0, %v67_v18  ;;  %v72_v21 = vsub.s32 1, %v67_v18 }
  0x18   :  { %v296_v14 = vld [vmem:[#allocation2 + $0x30] sm:$0xff]   ;;  %v297_v15 = vld [vmem:[#allocation2 + $0x78] sm:$0xff]   ;;  %v64_v20 = vld [vmem:[%s406_s2] sm:$0x3]  ;;  %p329_p11 = por %p328_p10, %p327_p9 }
  0x19   :  { %v298_v16 = vld [vmem:[#allocation2 + $0x38] sm:$0xff]   ;;  %v69_v22 = vrot.slane %v64_v20, %v68_v19  ;;  %v73_v23 = vrot.slane %v64_v20, %v72_v21 }
  0x1a   :  { %p330_p12 = pnand %p329_p11, %p323_p8 }
  0x1d   :  { %262 = vmatpush3.bf16.xpose.msra.mxu0 %v286_v3 }
  0x1e   :  { %263 = vmatprep.subr.bf16.mxu0 %v287_v4 }
  0x25   :  { %264 = vmatpush3.bf16.xpose.msra.mxu0 %v288_v5 }
  0x26   :  { %265 = vmatprep.subr.bf16.mxu0 %v289_v6 }
  0x2d   :  { %266 = vmatpush3.bf16.xpose.msra.mxu0 %v290_v8 }
  0x2e   :  { %267 = vmatprep.subr.bf16.mxu0 %v291_v9 }
  0x35   :  { %268 = vmatpush3.bf16.xpose.msra.mxu0 %v292_v10 }
  0x36   :  { %269 = vmatprep.subr.bf16.mxu0 %v293_v11 }
  0x3d   :  { %270 = vmatpush3.bf16.xpose.msra.mxu0 %v294_v12 }
  0x3e   :  { %271 = vmatprep.subr.bf16.mxu0 %v295_v13 }
  0x45   :  { %272 = vmatpush3.bf16.xpose.msra.mxu0 %v296_v14 }
  0x46   :  { %273 = vmatprep.subr.bf16.mxu0 %v297_v15 }
  0x4d   :  { %274 = vmatpush3.bf16.xpose.msra.mxu0 %v298_v16 }
  0x54   :  { %276 = vmatmul.mubr.bf16.vlgmr.msra.gmra.mrb[0].mxu0 %v299_v7 }
 0x127   :  { %v212_v24 = vpop.f32.mrb[0].mxu0 }
 0x128   :  { %v213_v25 = vadd.f32 %v212_v24, %v69_v22  ;;  %v214_v26 = vpop.f32.mrb[1].mxu0 }
 0x129   :  { %v215_v27 = vadd.f32 %v214_v26, %v73_v23  ;;  %v216_v28 = vpop.f32.mrb[2].mxu0 }
 0x12a   :  { %221 = vst [vmem:[#allocation5] sm:$0xff] %v213_v25  ;;  %v217_v29 = vadd.f32 %v216_v28, %v69_v22  ;;  %v218_v30 = vpop.f32.mrb[3].mxu0 }
 0x12b   :  { %222 = vst [vmem:[#allocation5 + $0x8] sm:$0xff] %v215_v27  ;;  %v219_v31 = vadd.f32 %v218_v30, %v73_v23 }
 0x12c   :  { %223 = vst [vmem:[#allocation5 + $0x10] sm:$0xff] %v217_v29 }
 0x12d   :  { %224 = vst [vmem:[#allocation5 + $0x18] sm:$0xff] %v219_v31 }
 0x12e   :  { %333 = shalt.err (!%p330_p12)
}
 0x12f   :  { %s334_s5 = scalar_lea.hbm %s407_s3, 512 }
 0x130   :  { %p335_p13 = scmp.ne.s32.totalorder %s407_s3, %s334_s5  ;;  %p338_p0 = scmp.lt.u32.totalorder %s334_s5, %s407_s3 }
 0x132   :  { %p340_p1 = pnand %p338_p0, %p335_p13 }
 0x134   :  { %343 = shalt.err (!%p340_p1)
}
 0x135   :  { %s352_s10 = smov 256   ;;  %s353_s11 = smov 16  }
 0x136   :  { %236 = dma.vmem_to_hbm [thread:$0]  %s231_s29, 512, %s407_s3, [#allocation4], %s352_s10, %s352_s10, %s353_s11  }
 0x137   :  { %346 = dma.done.wait [#allocation4], 512  }
 0x138   :  { %347 = vsyncadd [#allocation4], 4294966784 }
 0x139   :  { %240 = vsyncpa [#allocation3], 1 }
 0x13a   :  { %241 = vsyncpa [#allocation4], 1 }

</bundles_post_ra>
